<compile_context>
chip_gen: v6e
topology: v6e:2x2x1
jax: 0.10.0
libtpu: 0.0.40
codegen_flags: <defaults>
</compile_context>

<pallas_src>
import jax
import jax.numpy as jnp
from jax.experimental import pallas as pl
from jax.experimental.pallas import tpu as pltpu

BN_EPS = 1e-5


def discriminator_kernel(f1_ref, f2_ref, w1_ref, b1_ref, w2_ref, b2_ref,
                         out_ref, x_ref):
    ft_in = f1_ref.shape[1]

    f1 = f1_ref[...]                       # (TB, ft_in) bf16
    f2 = f2_ref[...]                       # (TB, ft_in) bf16
    f1f = f1.astype(jnp.float32)
    f2f = f2.astype(jnp.float32)

    # Build the lane-dense concat [f1 | f2 | |f1-f2| | f1*f2] in VMEM scratch
    # (masked sub-lane stores), so the first Linear is ONE K = 4*ft_in matmul.
    x_ref[:, 0 * ft_in:1 * ft_in] = f1
    x_ref[:, 1 * ft_in:2 * ft_in] = f2
    x_ref[:, 2 * ft_in:3 * ft_in] = jnp.abs(f1f - f2f).astype(jnp.bfloat16)
    x_ref[:, 3 * ft_in:4 * ft_in] = (f1f * f2f).astype(jnp.bfloat16)

    # Linear(4*ft_in -> H) with eval-mode BatchNorm folded into w1/b1.
    # bf16 operands, f32 accumulation on the MXU.
    h = (jnp.dot(x_ref[...], w1_ref[...], preferred_element_type=jnp.float32)
         + b1_ref[...])

    # ReLU (f32 on the VPU).
    h = jnp.maximum(h, 0.0)

    # TODO(synk): Dropout(p=0.5) is identity in eval mode; training-mode RNG masking omitted.

    # Linear(H -> 1) + sigmoid: VPU multiply + lane reduction (XLU slot),
    # avoiding a 1-column MXU pass.
    logits = jnp.sum(h * w2_ref[...], axis=-1, keepdims=True) + b2_ref[...]
    out_ref[...] = jax.nn.sigmoid(logits).astype(out_ref.dtype)


def discriminator_forward(feat1, feat2, params, *, tile_b=512):
    B, ft_in = feat1.shape
    H = params["w1"].shape[1]
    d_in = 4 * ft_in

    # ---- one-time constant folding of eval-mode BatchNorm into W1/b1 ----
    inv_std = jax.lax.rsqrt(params["var"] + BN_EPS)                 # (1, H)
    scale = params["gamma"] * inv_std                               # (1, H)
    w1f = (params["w1"] * scale).astype(jnp.bfloat16)               # (4*ft_in, H)
    b1f = ((params["b1"] - params["mean"]) * scale
           + params["beta"]).astype(jnp.float32)                    # (1, H)
    w2r = params["w2"].reshape(1, H).astype(jnp.float32)            # (1, H) row
    b2 = params["b2"].reshape(1, 1).astype(jnp.float32)             # (1, 1)

    # ---- batch tiling (multiple of 8 sublanes; pad B up to a full tile) ----
    tb = max(8, (min(tile_b, max(B, 8)) // 8) * 8)
    n_tiles = pl.cdiv(B, tb)
    Bp = n_tiles * tb

    f1 = feat1.astype(jnp.bfloat16)
    f2 = feat2.astype(jnp.bfloat16)
    if Bp != B:
        f1 = jnp.pad(f1, ((0, Bp - B), (0, 0)))
        f2 = jnp.pad(f2, ((0, Bp - B), (0, 0)))

    # Scoped-VMEM budget from the actual tile footprint (+ headroom), clamped
    # so it is safe on v7x's 64 MiB physical VMEM.
    est_vmem = (2 * 2 * tb * ft_in * 2      # double-buffered bf16 feature tiles
                + d_in * H * 2              # resident folded W1 (bf16)
                + tb * d_in * 2             # concat scratch (bf16)
                + 2 * tb * 4                # double-buffered output column
                + 2 * H * 4 + 256)          # b1, w2 rows, b2
    vmem_limit = int(min(max(2 * est_vmem, 16 * 1024 * 1024), 64 * 1024 * 1024))

    feat_spec = pl.BlockSpec((tb, ft_in), lambda i: (i, 0))
    resident = lambda i: (0, 0)             # constant block index -> DMA once

    out = pl.pallas_call(
        discriminator_kernel,
        out_shape=jax.ShapeDtypeStruct((Bp, 1), jnp.float32),
        grid=(n_tiles,),
        in_specs=[
            feat_spec,                         # feat1 tile
            feat_spec,                         # feat2 tile
            pl.BlockSpec((d_in, H), resident),  # W1 (BN folded), VMEM-resident
            pl.BlockSpec((1, H), resident),     # b1 (BN folded)
            pl.BlockSpec((1, H), resident),     # W2 as a row
            pl.BlockSpec((1, 1), resident),     # b2
        ],
        out_specs=pl.BlockSpec((tb, 1), lambda i: (i, 0)),
        scratch_shapes=[pltpu.VMEM((tb, d_in), jnp.bfloat16)],
        compiler_params=pltpu.CompilerParams(
            dimension_semantics=("parallel",),
            vmem_limit_bytes=vmem_limit),
    )(f1, f2, w1f, b1f, w2r, b2)

    return out[:B]


def init_params(key, ft_in, hidden):
    k1, k2, k3, k4, k5, k6 = jax.random.split(key, 6)
    d_in = 4 * ft_in
    w1 = jax.random.uniform(k1, (d_in, hidden), jnp.float32,
                            -1.0 / jnp.sqrt(d_in), 1.0 / jnp.sqrt(d_in))
    b1 = jax.random.uniform(k2, (1, hidden), jnp.float32,
                            -1.0 / jnp.sqrt(d_in), 1.0 / jnp.sqrt(d_in))
    w2 = jax.random.uniform(k3, (hidden, 1), jnp.float32,
                            -1.0 / jnp.sqrt(hidden), 1.0 / jnp.sqrt(hidden))
    b2 = jax.random.uniform(k4, (1, 1), jnp.float32,
                            -1.0 / jnp.sqrt(hidden), 1.0 / jnp.sqrt(hidden))
    gamma = 1.0 + 0.1 * jax.random.normal(k5, (1, hidden), jnp.float32)
    beta = 0.1 * jax.random.normal(k6, (1, hidden), jnp.float32)
    mean = 0.05 * jnp.arange(hidden, dtype=jnp.float32).reshape(1, hidden) / hidden
    var = jnp.ones((1, hidden), jnp.float32) * 1.2
    return dict(w1=w1, b1=b1, w2=w2, b2=b2, gamma=gamma, beta=beta,
                mean=mean, var=var)


def reference_forward(feat1, feat2, p):
    x = jnp.concatenate([feat1, feat2, jnp.abs(feat1 - feat2), feat1 * feat2], axis=1)
    h = x @ p["w1"] + p["b1"]
    h = (h - p["mean"]) * jax.lax.rsqrt(p["var"] + BN_EPS) * p["gamma"] + p["beta"]
    h = jnp.maximum(h, 0.0)
    return jax.nn.sigmoid(h @ p["w2"] + p["b2"])


if __name__ == "__main__":
    B, FT_IN, HIDDEN = 8, 32, 128   # small shapes: ft_in=32 -> concat dim 128
    key = jax.random.PRNGKey(0)
    kf1, kf2, kp = jax.random.split(key, 3)
    feat1 = jax.random.normal(kf1, (B, FT_IN), jnp.float32)
    feat2 = jax.random.normal(kf2, (B, FT_IN), jnp.float32)
    params = init_params(kp, FT_IN, HIDDEN)

    out = discriminator_forward(feat1, feat2, params)
    out = jax.block_until_ready(out)

    ref = reference_forward(feat1, feat2, params)
    assert out.shape == (B, 1)
    # bf16 input/matmul path (f32 accumulation) -> compare at ~1e-2 scale.
    assert jnp.allclose(out, ref, atol=3e-2, rtol=3e-2), "mismatch vs JAX reference"
    print("KERNEL_OK")
</pallas_src>

<mosaic_0001>
module attributes {stable_mosaic.version = 11 : i64} {
  func.func @discriminator_kernel(%arg0: i32, %arg1: memref<8x32xbf16, #tpu.memory_space<vmem>>, %arg2: memref<8x32xbf16, #tpu.memory_space<vmem>>, %arg3: memref<128x128xbf16, #tpu.memory_space<vmem>>, %arg4: memref<1x128xf32, #tpu.memory_space<vmem>>, %arg5: memref<1x128xf32, #tpu.memory_space<vmem>>, %arg6: memref<1x1xf32, #tpu.memory_space<vmem>>, %arg7: memref<8x1xf32, #tpu.memory_space<vmem>>, %arg8: memref<8x128xbf16, #tpu.memory_space<vmem>>) attributes {dimension_semantics = [#tpu.dimension_semantics<parallel>], iteration_bounds = array<i64: 1>, scalar_prefetch = 0 : i64, scratch_operands = 1 : i64, tpu.core_type = #tpu.core_type<tc>, window_params = [{transform_indices = @transform_0, window_bounds = array<i64: 8, 32>}, {transform_indices = @transform_1, window_bounds = array<i64: 8, 32>}, {pipeline_mode = #tpu.pipeline_mode<synchronous>, transform_indices = @transform_2, window_bounds = array<i64: 128, 128>}, {pipeline_mode = #tpu.pipeline_mode<synchronous>, transform_indices = @transform_3, window_bounds = array<i64: 1, 128>}, {pipeline_mode = #tpu.pipeline_mode<synchronous>, transform_indices = @transform_4, window_bounds = array<i64: 1, 128>}, {pipeline_mode = #tpu.pipeline_mode<synchronous>, transform_indices = @transform_5, window_bounds = array<i64: 1, 1>}, {transform_indices = @transform_6, window_bounds = array<i64: 8, 1>}]} {
    %c0 = arith.constant 0 : index
    %c0_0 = arith.constant 0 : index
    %0 = vector.load %arg1[%c0, %c0_0] : memref<8x32xbf16, #tpu.memory_space<vmem>>, vector<8x32xbf16>
    %c0_1 = arith.constant 0 : index
    %c0_2 = arith.constant 0 : index
    %1 = vector.load %arg2[%c0_1, %c0_2] : memref<8x32xbf16, #tpu.memory_space<vmem>>, vector<8x32xbf16>
    %2 = arith.extf %0 : vector<8x32xbf16> to vector<8x32xf32>
    %3 = arith.extf %1 : vector<8x32xbf16> to vector<8x32xf32>
    %c0_3 = arith.constant 0 : index
    %c0_4 = arith.constant 0 : index
    %4 = vector.load %arg8[%c0_3, %c0_4] : memref<8x128xbf16, #tpu.memory_space<vmem>>, vector<8x32xbf16>
    tpu.vector_store %arg8[%c0_3, %c0_4], %0 {strides = array<i32>} : memref<8x128xbf16, #tpu.memory_space<vmem>>, vector<8x32xbf16>,
    %c0_5 = arith.constant 0 : index
    %c32 = arith.constant 32 : index
    %5 = vector.load %arg8[%c0_5, %c32] : memref<8x128xbf16, #tpu.memory_space<vmem>>, vector<8x32xbf16>
    tpu.vector_store %arg8[%c0_5, %c32], %1 {strides = array<i32>} : memref<8x128xbf16, #tpu.memory_space<vmem>>, vector<8x32xbf16>,
    %6 = arith.subf %2, %3 : vector<8x32xf32>
    %7 = math.absf %6 : vector<8x32xf32>
    %8 = arith.truncf %7 : vector<8x32xf32> to vector<8x32xbf16>
    %c0_6 = arith.constant 0 : index
    %c64 = arith.constant 64 : index
    %9 = vector.load %arg8[%c0_6, %c64] : memref<8x128xbf16, #tpu.memory_space<vmem>>, vector<8x32xbf16>
    tpu.vector_store %arg8[%c0_6, %c64], %8 {strides = array<i32>} : memref<8x128xbf16, #tpu.memory_space<vmem>>, vector<8x32xbf16>,
    %10 = arith.mulf %2, %3 : vector<8x32xf32>
    %11 = arith.truncf %10 : vector<8x32xf32> to vector<8x32xbf16>
    %c0_7 = arith.constant 0 : index
    %c96 = arith.constant 96 : index
    %12 = vector.load %arg8[%c0_7, %c96] : memref<8x128xbf16, #tpu.memory_space<vmem>>, vector<8x32xbf16>
    tpu.vector_store %arg8[%c0_7, %c96], %11 {strides = array<i32>} : memref<8x128xbf16, #tpu.memory_space<vmem>>, vector<8x32xbf16>,
    %c0_8 = arith.constant 0 : index
    %c0_9 = arith.constant 0 : index
    %13 = vector.load %arg8[%c0_8, %c0_9] : memref<8x128xbf16, #tpu.memory_space<vmem>>, vector<8x128xbf16>
    %c0_10 = arith.constant 0 : index
    %c0_11 = arith.constant 0 : index
    %14 = vector.load %arg3[%c0_10, %c0_11] : memref<128x128xbf16, #tpu.memory_space<vmem>>, vector<128x128xbf16>
    %cst = arith.constant dense<0.000000e+00> : vector<8x128xf32>
    %15 = tpu.matmul %13, %14, %cst {dimension_numbers = #tpu.dot_dimension_numbers<[1], [0], [0], [1], [0, 0, 1, 1], [], []>} : vector<8x128xbf16>, vector<128x128xbf16>, vector<8x128xf32> -> vector<8x128xf32>
    %c0_12 = arith.constant 0 : index
    %c0_13 = arith.constant 0 : index
    %16 = vector.load %arg4[%c0_12, %c0_13] : memref<1x128xf32, #tpu.memory_space<vmem>>, vector<1x128xf32>
    %17 = vector.broadcast %16 : vector<1x128xf32> to vector<8x128xf32>
    %18 = arith.addf %15, %17 : vector<8x128xf32>
    %cst_14 = arith.constant 0.000000e+00 : f32
    %19 = vector.broadcast %cst_14 : f32 to vector<8x128xf32>
    %20 = arith.maximumf %18, %19 : vector<8x128xf32>
    %c0_15 = arith.constant 0 : index
    %c0_16 = arith.constant 0 : index
    %21 = vector.load %arg5[%c0_15, %c0_16] : memref<1x128xf32, #tpu.memory_space<vmem>>, vector<1x128xf32>
    %22 = vector.broadcast %21 : vector<1x128xf32> to vector<8x128xf32>
    %23 = arith.mulf %20, %22 : vector<8x128xf32>
    %cst_17 = arith.constant dense<0.000000e+00> : vector<8xf32>
    %24 = vector.multi_reduction <add>, %23, %cst_17 [1] : vector<8x128xf32> to vector<8xf32>
    %25 = vector.shape_cast %24 : vector<8xf32> to vector<8x1xf32>
    %c0_18 = arith.constant 0 : index
    %c0_19 = arith.constant 0 : index
    %26 = vector.load %arg6[%c0_18, %c0_19] : memref<1x1xf32, #tpu.memory_space<vmem>>, vector<1x1xf32>
    %27 = vector.broadcast %26 : vector<1x1xf32> to vector<8x1xf32>
    %28 = arith.addf %25, %27 : vector<8x1xf32>
    %29 = arith.negf %28 : vector<8x1xf32>
    %30 = math.exp %29 : vector<8x1xf32>
    %cst_20 = arith.constant 1.000000e+00 : f32
    %31 = vector.broadcast %cst_20 : f32 to vector<8x1xf32>
    %32 = arith.addf %31, %30 : vector<8x1xf32>
    %33 = arith.divf %31, %32 : vector<8x1xf32>
    %c0_21 = arith.constant 0 : index
    %c0_22 = arith.constant 0 : index
    %34 = vector.load %arg7[%c0_21, %c0_22] : memref<8x1xf32, #tpu.memory_space<vmem>>, vector<8x1xf32>
    tpu.vector_store %arg7[%c0_21, %c0_22], %33 {strides = array<i32>} : memref<8x1xf32, #tpu.memory_space<vmem>>, vector<8x1xf32>,
    return
  }
  func.func @transform_0(%arg0: i32) -> (i32, i32) {
    %c0_i32 = arith.constant 0 : i32
    %c0_i32_0 = arith.constant 0 : i32
    return %arg0, %c0_i32 : i32, i32
  }
  func.func @transform_1(%arg0: i32) -> (i32, i32) {
    %c0_i32 = arith.constant 0 : i32
    %c0_i32_0 = arith.constant 0 : i32
    return %arg0, %c0_i32 : i32, i32
  }
  func.func @transform_2(%arg0: i32) -> (i32, i32) {
    %c0_i32 = arith.constant 0 : i32
    %c0_i32_0 = arith.constant 0 : i32
    %c0_i32_1 = arith.constant 0 : i32
    return %c0_i32, %c0_i32_0 : i32, i32
  }
  func.func @transform_3(%arg0: i32) -> (i32, i32) {
    %c0_i32 = arith.constant 0 : i32
    %c0_i32_0 = arith.constant 0 : i32
    %c0_i32_1 = arith.constant 0 : i32
    return %c0_i32, %c0_i32_0 : i32, i32
  }
  func.func @transform_4(%arg0: i32) -> (i32, i32) {
    %c0_i32 = arith.constant 0 : i32
    %c0_i32_0 = arith.constant 0 : i32
    %c0_i32_1 = arith.constant 0 : i32
    return %c0_i32, %c0_i32_0 : i32, i32
  }
  func.func @transform_5(%arg0: i32) -> (i32, i32) {
    %c0_i32 = arith.constant 0 : i32
    %c0_i32_0 = arith.constant 0 : i32
    %c0_i32_1 = arith.constant 0 : i32
    return %c0_i32, %c0_i32_0 : i32, i32
  }
  func.func @transform_6(%arg0: i32) -> (i32, i32) {
    %c0_i32 = arith.constant 0 : i32
    %c0_i32_0 = arith.constant 0 : i32
    return %arg0, %c0_i32 : i32, i32
  }
}

</mosaic_0001>

<bundles_post_ra>
// kernel: tpu_custom_call.1
= control target key start
LH: loop header
LB: loop body
LE: loop exit
PB: predicated region body
PF: predicated region fallthrough
CT: control target
= control target key end

     0   :  { %s439_s0 = inlined_call_operand.hbm [shape: bf16[8,32], index: 0, kind: input, shape index: {}]   ;;  %s440_s1 = inlined_call_operand.hbm [shape: bf16[8,32], index: 1, kind: input, shape index: {}]   ;;  %s441_s2 = inlined_call_operand.hbm [shape: bf16[128,128], index: 2, kind: input, shape index: {}]   ;;  %s442_s3 = inlined_call_operand.vmem [shape: f32[1,128], index: 3, kind: input, shape index: {}]   ;;  %s443_s4 = inlined_call_operand.vmem [shape: f32[1,128], index: 4, kind: input, shape index: {}]   ;;  %s444_s5 = inlined_call_operand.<no memory space> [shape: f32[1,1], index: 5, kind: input, shape index: {}]   ;;  %s445_s6 = inlined_call_operand.vmem [shape: f32[8,1], index: 6, kind: output, shape index: {}]  }
   0x1   :  { %v11_v0 = vstv %s444_s5 }
   0x2   :  { %12 = vst [vmem:[#allocation3] sm:$0x1] %v11_v0 }
   0x3   :  { %13 = vsyncpa [#allocation5], 0 }
   0x4   :  { %14 = vsyncpa [#allocation7], 0  ;;  %s371_s23 = smov [#allocation6]   ;;  %s372_s25 = smov [#allocation4]  }
   0x5   :  { %s31_s24 = sshll.u32 %s371_s23, 4  ;;  %s21_s26 = sshll.u32 %s372_s25, 4  ;;  %s32_s24 = int_to_ptr.vmem [resolvable:$true] %s31_s24  ;;  %s22_s26 = int_to_ptr.vmem [resolvable:$true] %s21_s26 }
   0x6   :  { %s315_s27 = scalar_lea.vmem %s32_s24, 64  ;;  %p320_p1 = scmp.lt.s32.totalorder %s32_s24, %s32_s24 }
   0x7   :  { %p316_p0 = scmp.ne.s32.totalorder %s32_s24, %s315_s27  ;;  %p321_p2 = scmp.lt.s32.totalorder %s315_s27, %s315_s27 }
   0x9   :  { %p322_p3 = por %p321_p2, %p320_p1 }
   0xb   :  { %p323_p4 = pnand %p322_p3, %p316_p0 }
   0xd   :  { %326 = shalt.err (!%p323_p4)
}
   0xe   :  { %34 = dma.hbm_to_vmem [thread:$0]  %s440_s1, 64, %s32_s24, [#allocation7]  }
   0xf   :  { %s335_s5 = scalar_lea.vmem %s22_s26, 64  ;;  %p340_p6 = scmp.lt.s32.totalorder %s22_s26, %s22_s26 }
  0x10   :  { %p336_p5 = scmp.ne.s32.totalorder %s22_s26, %s335_s5  ;;  %p341_p7 = scmp.lt.s32.totalorder %s335_s5, %s335_s5 }
  0x12   :  { %p342_p8 = por %p341_p7, %p340_p6 }
  0x14   :  { %p343_p9 = pnand %p342_p8, %p336_p5 }
  0x16   :  { %346 = shalt.err (!%p343_p9)
}
  0x17   :  { %24 = dma.hbm_to_vmem [thread:$0]  %s439_s0, 64, %s22_s26, [#allocation5]  }
  0x18   :  { %s373_s8 = smov [#allocation8]  }
  0x19   :  { %s40_s9 = sshll.u32 %s373_s8, 4  ;;  %s41_s9 = int_to_ptr.vmem [resolvable:$true] %s40_s9 }
  0x1a   :  { %s355_s10 = scalar_lea.vmem %s41_s9, 1024  ;;  %p360_p11 = scmp.lt.s32.totalorder %s41_s9, %s41_s9 }
  0x1b   :  { %p356_p10 = scmp.ne.s32.totalorder %s41_s9, %s355_s10  ;;  %p361_p12 = scmp.lt.s32.totalorder %s355_s10, %s355_s10 }
  0x1d   :  { %p362_p13 = por %p361_p12, %p360_p11 }
  0x1f   :  { %p363_p0 = pnand %p362_p13, %p356_p10 }
  0x21   :  { %366 = shalt.err (!%p363_p0)
}
  0x22   :  { %s374_s1 = smov 64   ;;  %s375_s11 = smov 4  }
  0x23   :  { %46 = dma.hbm_to_vmem [thread:$0]  %s441_s2, 1024, %s41_s9, [#allocation7], %s374_s1, %s374_s1, %s375_s11  }
  0x24   :  { %367 = dma.done.wait [#allocation5], 64  }
  0x25   :  { %368 = vsyncadd [#allocation5], 4294967232 }
  0x26   :  { %369 = dma.done.wait [#allocation7], 1088  }
  0x27   :  { %370 = vsyncadd [#allocation7], 4294966208  ;;  %v376_v1 = vmov 0.0   ;;  %vm67_vm0 = vcmask 257024   ;;  %vm377_vm1 = vmmov 0   ;;  %s378_s0 = smov 32  }
  0x28   :  { %266 = vmatprep.subr.bf16.mxu0 %v376_v1  ;;  %282 = vmatprep.mubr.msk.bf16.mxu0 %vm377_vm1, %v376_v1  ;;  %v64_v2 = vld [vmem:[#allocation6] sm:$0xf]  ;;  %v63_v3 = vld [vmem:[#allocation4] sm:$0xf]  ;;  %v296_v9 = vld [vmem:[#allocation8 + $0x30] sm:$0xff]   ;;  %s379_s2 = smov 96  }
  0x29   :  { %70 = vrot.lane.b32.xlu0 %v64_v2, %s378_s0  ;;  %v66_v4 = vunpack.c.l.bf16 %v64_v2  ;;  %v65_v5 = vunpack.c.l.bf16 %v63_v3  ;;  %v295_v6 = vld [vmem:[#allocation8 + $0x38] sm:$0xff]   ;;  %68 = vst.msk [vmem:[#allocation2] sm:$0xf] %vm67_vm0, %v63_v3  ;;  %v297_v13 = vld [vmem:[#allocation8 + $0x28] sm:$0xff]   ;;  %v298_v14 = vld [vmem:[#allocation8 + $0x20] sm:$0xff]   ;;  %vm73_vm2 = vcmask 519424  }
  0x2a   :  { %267 = vmatpush3.bf16.msra.mxu0 %v295_v6  ;;  %v299_v15 = vld [vmem:[#allocation8 + $0x18] sm:$0xff]   ;;  %v300_v16 = vld [vmem:[#allocation8 + $0x10] sm:$0xff]   ;;  %v301_v17 = vld [vmem:[#allocation8 + $0x8] sm:$0xff]   ;;  %vm84_vm3 = vcmask 781824   ;;  %vm94_vm4 = vcmask 1044224   ;;  %vm233_vm5 = vcmask 7168  }
  0x2b   :  { %v75_v7 = vsub.f32 %v65_v5, %v66_v4  ;;  %v86_v8 = vmul.f32 %v66_v4, %v65_v5  ;;  %268 = vmatprep.subr.bf16.mxu0 %v376_v1  ;;  %v302_v18 = vld [vmem:[#allocation8] sm:$0xff]   ;;  %v243_v23 = vld [vmem:[%s442_s3] ss:$0 sm:$0xff]  ;;  %v253_v32 = vld [vmem:[#allocation3] ss:$0 sm:$0xff] }
  0x2c   :  { %v252_v27 = vld [vmem:[%s443_s4] ss:$0 sm:$0xff] }
  0x2d   :  { %v76_v10 = vand.u32 2147483647, %v75_v7  ;;  %v256_v11 = vpack.c.bf16 %v86_v8, %v86_v8 }
  0x2e   :  { %269 = vmatpush3.bf16.msra.mxu0 %v296_v9 }
  0x2f   :  { %v255_v12 = vpack.c.bf16 %v76_v10, %v76_v10  ;;  %91 = vrot.lane.b32.xlu1 %v256_v11, %s379_s2  ;;  %270 = vmatprep.subr.bf16.mxu0 %v376_v1 }
  0x31   :  { %81 = vrot.lane.b32.xlu0 %v255_v12, %s374_s1 }
  0x32   :  { %271 = vmatpush3.bf16.msra.mxu0 %v297_v13 }
  0x33   :  { %272 = vmatprep.subr.bf16.mxu0 %v376_v1 }
  0x36   :  { %273 = vmatpush3.bf16.msra.mxu0 %v298_v14 }
  0x37   :  { %274 = vmatprep.subr.bf16.mxu0 %v376_v1 }
  0x3a   :  { %275 = vmatpush3.bf16.msra.mxu0 %v299_v15 }
  0x3b   :  { %276 = vmatprep.subr.bf16.mxu0 %v376_v1 }
  0x3e   :  { %277 = vmatpush3.bf16.msra.mxu0 %v300_v16 }
  0x3f   :  { %278 = vmatprep.subr.bf16.mxu0 %v376_v1 }
  0x42   :  { %279 = vmatpush3.bf16.msra.mxu0 %v301_v17 }
  0x43   :  { %280 = vmatprep.subr.bf16.mxu0 %v376_v1 }
  0x46   :  { %281 = vmatpush3.bf16.msra.mxu0 %v302_v18 }
  0x9b   :  { %v71_v19 = vpop.permute.xlu0 %70 }
  0x9c   :  { %74 = vst.msk [vmem:[#allocation2] sm:$0xf] %vm73_vm2, %v71_v19 }
  0xa1   :  { %v92_v20 = vpop.permute.xlu1 %91 }
  0xa3   :  { %v82_v21 = vpop.permute.xlu0 %81 }
  0xa4   :  { %85 = vst.msk [vmem:[#allocation2] sm:$0xf] %vm84_vm3, %v82_v21 }
  0xa5   :  { %95 = vst.msk [vmem:[#allocation2] sm:$0xf] %vm94_vm4, %v92_v20 }
  0xac   :  { %v96_v22 = vld [vmem:[#allocation2] sm:$0xf] }
  0xad   :  { %283 = vmatmul.mubr.bf16.vlgmr.msra.gmra.mxu0 %v96_v22 }
 0x16d   :  { %v202_v24 = vpop.f32.mrf.mxu0 }
 0x16e   :  { %v203_v25 = vadd.f32 %v243_v23, %v202_v24 }
 0x16f   :  { %v284_v26 = vpop.f32.mrf.mxu0 }
 0x170   :  { %v208_v28 = vmax.f32 %v203_v25, 0.0 }
 0x171   :  { %v205_v29 = vpop.f32.mrf.mxu0 }
 0x172   :  { %v216_v30 = vmul.f32 %v252_v27, %v208_v28 }
 0x173   :  { %v285_v31 = vpop.f32.mrf.mxu0 }
 0x174   :  { %217 = vadd.xlane.f32.xlu1 %v216_v30 }
 0x1fd   :  { %v218_v33 = vpop.xlane.xlu1 %217 }
 0x1fe   :  { %v226_v34 = vadd.f32 %v253_v32, %v218_v33 }
 0x200   :  { %v254_v35 = vmul.f32 -1.442695, %v226_v34 }
 0x202   :  { %303 = vpow2.f32 %v254_v35 }
 0x20f   :  { %v304_v36 = vpop.eup %303 }
 0x210   :  { %v230_v37 = vadd.f32 1.0, %v304_v36 }
 0x212   :  { %305 = vrcp.f32 %v230_v37 }
 0x21f   :  { %v306_v38 = vpop.eup %305 }
 0x220   :  { %234 = vst.msk [vmem:[%s445_s6] sm:$0xff] %vm233_vm5, %v306_v38 }
 0x221   :  { %239 = vsyncpa [#allocation5], 1 }
 0x222   :  { %240 = vsyncpa [#allocation7], 1 }

</bundles_post_ra>
